<compile_context>
chip_gen: v7x
topology: tpu7x:2x2x1
jax: 0.10.0
libtpu: 0.0.40
codegen_flags: <defaults>
</compile_context>

<pallas_src>
import functools
import math

import jax
import jax.numpy as jnp
from jax.experimental import pallas as pl
from jax.experimental.pallas import tpu as pltpu


def _spectral_embed_kernel(x_ref, w_ref, b_ref, o_ref):
    # x_ref: (tm, K)   w_ref: (K, F)   b_ref: (1, F)   o_ref: (tm, F)
    # K is tiny (2 .. 2g).  The MXU is otherwise idle and its push lives in the
    # vector-extended slot, so the contraction is effectively free; the VPU only
    # does the bias add + cast, the EUP does tanh.  Everything hides under DMA.
    acc = jnp.dot(x_ref[...].astype(jnp.float32),
                  w_ref[...].astype(jnp.float32),
                  preferred_element_type=jnp.float32)
    acc = acc + b_ref[...].astype(jnp.float32)          # (1, F) broadcasts over rows
    o_ref[...] = jnp.tanh(acc).astype(o_ref.dtype)      # EUP transcendental


def _round_up(a, b):
    return (a + b - 1) // b * b


@functools.partial(jax.jit, static_argnames=("tm",))
def spectral_embed(x, weight, bias, *, tm=8192):
    """tanh(x @ weight + bias).  x: (..., 2), weight: (2, F), bias: (F,)."""
    in_features = x.shape[-1]
    n_filters = weight.shape[1]
    assert weight.shape[0] == in_features, "weight/in-feature mismatch"
    lead_shape = x.shape[:-1]

    x2d = x.reshape(-1, in_features)
    m = x2d.shape[0]
    if m == 0:
        return jnp.zeros((*lead_shape, n_filters), x.dtype)

    itemsize = jnp.dtype(x.dtype).itemsize

    # ---- lane-dense output packing --------------------------------------
    # Pack g consecutive rows into one output row of f_eff = g*F lanes (f_eff a
    # multiple of 128) -> every output store is an unmasked full-lane vst.
    # Only enabled when it costs nothing: m % g == 0 (no pad, no post-kernel
    # slice/copy of the output) and the block-diagonal weight stays tiny.
    if n_filters % 128 == 0:
        g = 1
    else:
        g = 128 // math.gcd(n_filters, 128)          # = lcm(F, 128) // F
    k_eff = in_features * g
    f_eff = n_filters * g
    if g > 1 and (m % g != 0 or f_eff > 1024 or k_eff * f_eff * 4 > (1 << 19)):
        g = 1                                        # fallback: masked stores
        k_eff = in_features
        f_eff = n_filters
    mp = m // g

    x_packed = x2d.reshape(mp, k_eff)                # row-major -> free bitcast
    if g == 1:
        w_packed = weight
        b_packed = bias.reshape(1, n_filters)
    else:
        # Block-diagonal weight: packed row r contributes only to its own F slot.
        eye_g = jnp.eye(g, dtype=weight.dtype)
        w_packed = jnp.einsum("rs,kf->rksf", eye_g, weight).reshape(k_eff, f_eff)
        b_packed = jnp.tile(bias, g).reshape(1, f_eff)

    # ---- generation-aware row-tile byte budget ---------------------------
    try:
        vmem_cap = int(getattr(pltpu.get_tpu_info(), "vmem_capacity_bytes", 0))
    except Exception:
        vmem_cap = 0
    if vmem_cap >= (100 << 20):          # v5e / v6e: 128 MiB physical VMEM
        ws_budget = 16 << 20             # double-buffered working-set budget
        vmem_limit = 64 << 20
    else:                                # v7x (64 MiB physical) or unknown
        ws_budget = 8 << 20
        vmem_limit = 40 << 20

    # Per packed-row VMEM bytes: x block is lane-padded to 128 in VMEM, plus the
    # output block (both double-buffered), plus the f32 matmul/tanh temporaries.
    row_bytes = (2 * (_round_up(k_eff, 128) * itemsize + f_eff * itemsize)
                 + f_eff * 4)
    budget_rows = max(32, ws_budget // row_bytes // 32 * 32)

    tm_eff = max(32, min(tm, budget_rows) // 32 * 32)
    # Keep >= ~4 grid steps for moderate m so v7x can shard the "parallel" row
    # axis across both TensorCores (floor of 512 rows so tiles never become
    # per-step-overhead bound).
    tm_eff = min(tm_eff, max(512, _round_up(pl.cdiv(mp, 4), 32)))
    tm_eff = min(tm_eff, _round_up(mp, 8))           # never over-allocate small m
    tm_eff = max(8, tm_eff)
    grid = pl.cdiv(mp, tm_eff)                       # Pallas masks the ragged tail

    cost = pl.CostEstimate(
        flops=2 * mp * k_eff * f_eff,
        transcendentals=mp * f_eff,
        bytes_accessed=(mp * k_eff + k_eff * f_eff + f_eff + mp * f_eff) * itemsize,
    )

    out = pl.pallas_call(
        _spectral_embed_kernel,
        out_shape=jax.ShapeDtypeStruct((mp, f_eff), x.dtype),
        grid_spec=pltpu.PrefetchScalarGridSpec(
            num_scalar_prefetch=0,
            grid=(grid,),
            in_specs=[
                pl.BlockSpec((tm_eff, k_eff), lambda i: (i, 0)),
                pl.BlockSpec((k_eff, f_eff), lambda i: (0, 0)),
                pl.BlockSpec((1, f_eff), lambda i: (0, 0)),
            ],
            out_specs=pl.BlockSpec((tm_eff, f_eff), lambda i: (i, 0)),
        ),
        compiler_params=pltpu.CompilerParams(
            dimension_semantics=("parallel",),       # shard rows across v7x TCs
            vmem_limit_bytes=vmem_limit,
        ),
        cost_estimate=cost,
    )(x_packed, w_packed, b_packed)

    out = out.reshape(m, n_filters)                  # free un-pack reshape
    return out.reshape(*lead_shape, n_filters)


if __name__ == "__main__":
    n_filters = 64
    batch, seq = 2, 8          # x: (batch, seq, 2) — (spectra value, band) pairs

    key = jax.random.PRNGKey(0)
    kx, kw, kb = jax.random.split(key, 3)

    # Same shapes as nn.Linear(2, n_filters); weight stored as (in, out).
    bound = 1.0 / jnp.sqrt(2.0)
    weight = jax.random.uniform(kw, (2, n_filters), jnp.float32, -bound, bound)
    bias = jax.random.uniform(kb, (n_filters,), jnp.float32, -bound, bound)

    x = jax.random.normal(kx, (batch, seq, 2), jnp.float32)

    out = spectral_embed(x, weight, bias)
    out = jax.block_until_ready(out)

    # Pure-JAX reference of the same semantics: tanh(x @ W + b).
    ref = jnp.tanh(x @ weight + bias)
    assert out.shape == (batch, seq, n_filters)
    assert jnp.allclose(out, ref, atol=1e-5, rtol=1e-5)

    print("KERNEL_OK")
</pallas_src>

<mosaic_0001>
module attributes {stable_mosaic.version = 11 : i64} {
  func.func @_spectral_embed_kernel(%arg0: i32, %arg1: memref<8x4xf32, #tpu.memory_space<vmem>>, %arg2: memref<4x128xf32, #tpu.memory_space<vmem>>, %arg3: memref<1x128xf32, #tpu.memory_space<vmem>>, %arg4: memref<8x128xf32, #tpu.memory_space<vmem>>) attributes {dimension_semantics = [#tpu.dimension_semantics<parallel>], iteration_bounds = array<i64: 1>, scalar_prefetch = 0 : i64, scratch_operands = 0 : i64, tpu.core_type = #tpu.core_type<tc>, window_params = [{transform_indices = @transform_0, window_bounds = array<i64: 8, 4>}, {pipeline_mode = #tpu.pipeline_mode<synchronous>, transform_indices = @transform_1, window_bounds = array<i64: 4, 128>}, {pipeline_mode = #tpu.pipeline_mode<synchronous>, transform_indices = @transform_2, window_bounds = array<i64: 1, 128>}, {transform_indices = @transform_3, window_bounds = array<i64: 8, 128>}]} {
    %c0 = arith.constant 0 : index
    %c0_0 = arith.constant 0 : index
    %0 = vector.load %arg1[%c0, %c0_0] : memref<8x4xf32, #tpu.memory_space<vmem>>, vector<8x4xf32>
    %c0_1 = arith.constant 0 : index
    %c0_2 = arith.constant 0 : index
    %1 = vector.load %arg2[%c0_1, %c0_2] : memref<4x128xf32, #tpu.memory_space<vmem>>, vector<4x128xf32>
    %cst = arith.constant dense<0.000000e+00> : vector<8x128xf32>
    %2 = tpu.matmul %0, %1, %cst {dimension_numbers = #tpu.dot_dimension_numbers<[1], [0], [0], [1], [0, 0, 1, 1], [], []>} : vector<8x4xf32>, vector<4x128xf32>, vector<8x128xf32> -> vector<8x128xf32>
    %c0_3 = arith.constant 0 : index
    %c0_4 = arith.constant 0 : index
    %3 = vector.load %arg3[%c0_3, %c0_4] : memref<1x128xf32, #tpu.memory_space<vmem>>, vector<1x128xf32>
    %4 = vector.broadcast %3 : vector<1x128xf32> to vector<8x128xf32>
    %5 = arith.addf %2, %4 : vector<8x128xf32>
    %6 = math.tanh %5 : vector<8x128xf32>
    %c0_5 = arith.constant 0 : index
    %c0_6 = arith.constant 0 : index
    %7 = vector.load %arg4[%c0_5, %c0_6] : memref<8x128xf32, #tpu.memory_space<vmem>>, vector<8x128xf32>
    tpu.vector_store %arg4[%c0_5, %c0_6], %6 {strides = array<i32>} : memref<8x128xf32, #tpu.memory_space<vmem>>, vector<8x128xf32>,
    return
  }
  func.func @transform_0(%arg0: i32) -> (i32, i32) {
    %c0_i32 = arith.constant 0 : i32
    %c0_i32_0 = arith.constant 0 : i32
    return %arg0, %c0_i32 : i32, i32
  }
  func.func @transform_1(%arg0: i32) -> (i32, i32) {
    %c0_i32 = arith.constant 0 : i32
    %c0_i32_0 = arith.constant 0 : i32
    %c0_i32_1 = arith.constant 0 : i32
    return %c0_i32, %c0_i32_0 : i32, i32
  }
  func.func @transform_2(%arg0: i32) -> (i32, i32) {
    %c0_i32 = arith.constant 0 : i32
    %c0_i32_0 = arith.constant 0 : i32
    %c0_i32_1 = arith.constant 0 : i32
    return %c0_i32, %c0_i32_0 : i32, i32
  }
  func.func @transform_3(%arg0: i32) -> (i32, i32) {
    %c0_i32 = arith.constant 0 : i32
    %c0_i32_0 = arith.constant 0 : i32
    return %arg0, %c0_i32 : i32, i32
  }
}

</mosaic_0001>

<bundles_post_ra>
// kernel: tile.8
= control target key start
LH: loop header
LB: loop body
LE: loop exit
PB: predicated region body
PF: predicated region fallthrough
CT: control target
= control target key end

     0   :  { %s22_s0 = inlined_call_operand.vmem [shape: f32[64], index: 0, kind: input, shape index: {}]   ;;  %s23_s1 = inlined_call_operand.vmem [shape: f32[2,64], index: 1, kind: output, shape index: {}]  }
   0x1   :  { %v4_v0 = vld [vmem:[%s22_s0] ss:$0 sm:$0xff] }
   0x2   :  { %5 = vst [vmem:[%s23_s1] sm:$0x3] %v4_v0 }

// kernel: tile.9
= control target key start
LH: loop header
LB: loop body
LE: loop exit
PB: predicated region body
PF: predicated region fallthrough
CT: control target
= control target key end

     0   :  { %vm7_vm0 = vcmask 523264   ;;  %vm13_vm1 = vcmask 1048064   ;;  %s39_s0 = inlined_call_operand.vmem [shape: f32[2,64], index: 0, kind: input, shape index: {}]   ;;  %s40_s1 = inlined_call_operand.vmem [shape: f32[1,128], index: 1, kind: output, shape index: {}]  }
   0x1   :  { %v4_v0 = vld [vmem:[%s39_s0] sm:$0x3]  ;;  %s22_s0 = smov 64  }
   0x2   :  { %5 = vst [vmem:[#allocation1] sm:$0x3] %v4_v0 }
   0x9   :  { %v10_v1 = vld [vmem:[#allocation1 + $0x1] sm:$0x1]   ;;  %v6_v2 = vld [vmem:[#allocation1] sm:$0x1]  }
   0xa   :  { %11 = vrot.lane.b32.xlu0 %v10_v1, %s22_s0  ;;  %8 = vst.msk [vmem:[#allocation0] sm:$0x1] %vm7_vm0, %v6_v2  }
  0x7c   :  { %v12_v3 = vpop.permute.xlu0 %11  }
  0x7d   :  { %14 = vst.msk [vmem:[#allocation0] sm:$0x1] %vm13_vm1, %v12_v3  }
  0x84   :  { %v18_v4 = vld [vmem:[#allocation0] sm:$0x1] }
  0x85   :  { %20 = vst [vmem:[%s40_s1] sm:$0x1] %v18_v4 }

// kernel: spectral_embed.1
= control target key start
LH: loop header
LB: loop body
LE: loop exit
PB: predicated region body
PF: predicated region fallthrough
CT: control target
= control target key end

     0   :  { %vm27_vm0 = vcmask 1043456   ;;  %vm23_vm1 = vcmask 31744   ;;  %v121_v0 = vmov 0.0   ;;  %vm122_vm2 = vmmov 0   ;;  %s155_s1 = inlined_call_operand.vmem [shape: f32[4,128], index: 1, kind: input, shape index: {}]   ;;  %s156_s0 = inlined_call_operand.vmem [shape: f32[8,4], index: 0, kind: input, shape index: {}]   ;;  %s157_s2 = inlined_call_operand.vmem [shape: f32[1,128], index: 2, kind: input, shape index: {}]   ;;  %s158_s3 = inlined_call_operand.vmem [shape: f32[8,128], index: 3, kind: output, shape index: {}]  }
   0x1   :  { %112 = vmatprep.subr.mxu0 %v121_v0  ;;  %v15_v1 = vld [vmem:[%s155_s1] sm:$0xf]  ;;  %114 = vmatprep.mubr.msk.f32.mxu0 %vm122_vm2, %v121_v0 }
   0x2   :  { %v14_v2 = vld [vmem:[%s156_s0] sm:$0xff]  ;;  %113 = vmatpush3.msk.msra.mxu0 %vm27_vm0, %v15_v1 }
   0x3   :  { %115 = vmatmul.mubr.msk.f32.vlgmr.msra.gmra.mrb[0].mxu0 %vm23_vm1, %v14_v2  ;;  %v107_v3 = vld [vmem:[%s157_s2] ss:$0 sm:$0xff] }
  0xd6   :  { %v97_v4 = vpop.f32.mrb[0].mxu0 }
  0xd7   :  { %v98_v5 = vadd.f32 %v107_v3, %v97_v4  ;;  %v116_v6 = vpop.f32.mrb[1].mxu0 }
  0xd9   :  { %119 = vtanh.f32 %v98_v5 }
  0xe3   :  { %v120_v7 = vpop.eup %119 }
  0xe4   :  { %102 = vst [vmem:[%s158_s3] sm:$0xff] %v120_v7 }

</bundles_post_ra>
